<compile_context>
chip_gen: v5e
topology: v5e:2x2
jax: 0.10.0
libtpu: 0.0.40
codegen_flags: <defaults>
</compile_context>

<pallas_src>
import functools

import jax
import jax.numpy as jnp
from jax.experimental import pallas as pl
from jax.experimental.pallas import tpu as pltpu


# ----------------------------- kernel ----------------------------------------


def _mapping_kernel(x_ref, scales_ref, w_a_ref, w_g_ref, w_dn_ref, o_ref, *,
                    eps, n_layers, d_model):
    # x_ref:      [tm, Dp]         activations (model dtype)
    # scales_ref: [L+2, Dp]        f32 norm scales (row 0 = in_norm,
    #                              rows 1..L = block norms, row L+1 = out_norm)
    # w_a_ref:    [L, Dp, Fp]      pre-transposed up_proj (value half)
    # w_g_ref:    [L, Dp, Fp]      pre-transposed up_proj (gate half)
    # w_dn_ref:   [L, Fp, Dp]      pre-transposed down_proj
    inv_d = 1.0 / float(d_model)

    def _rms_norm(v, scale_row_f32):
        # matches torch rms_norm: mean over the REAL d_model (padded lanes are 0)
        vf = v.astype(jnp.float32)
        mean_sq = jnp.sum(vf * vf, axis=-1, keepdims=True) * inv_d
        s = scale_row_f32 * jax.lax.rsqrt(mean_sq + eps)          # f32 [tm, Dp]
        return v * s.astype(v.dtype)

    x = x_ref[...]                                                # [tm, Dp]

    # input RMSNorm (fused)
    x = _rms_norm(x, scales_ref[0:1, :].astype(jnp.float32))

    # FeedForward blocks (static unroll over layers, weights stay resident)
    for l in range(n_layers):
        skip = x
        xn = _rms_norm(x, scales_ref[l + 1:l + 2, :].astype(jnp.float32))
        # up_proj (LinearSwiGLU, bias=False): two matmuls, f32 accumulation
        a = jnp.dot(xn, w_a_ref[l], preferred_element_type=jnp.float32)
        g = jnp.dot(xn, w_g_ref[l], preferred_element_type=jnp.float32)
        h = a * (g * jax.nn.sigmoid(g))                           # SwiGLU (EUP)
        # down_proj (bias=False) + residual
        d = jnp.dot(h.astype(x.dtype), w_dn_ref[l],
                    preferred_element_type=jnp.float32)
        x = (d + skip.astype(jnp.float32)).astype(o_ref.dtype)

    # output RMSNorm (fused)
    x = _rms_norm(x, scales_ref[n_layers + 1:n_layers + 2, :].astype(jnp.float32))
    o_ref[...] = x.astype(o_ref.dtype)


# ----------------------------- wrappers ---------------------------------------


def _round_up(a, b):
    return ((a + b - 1) // b) * b


def prepare_pallas_params(params, *, lane=128):
    """One-time conversion: transpose, stack and lane-pad the weights."""
    blocks = params["blocks"]
    n_layers = len(blocks)
    d_model = params["in_norm_scale"].shape[0]
    d_ff = blocks[0]["w_down"].shape[1]
    dp = _round_up(d_model, lane)
    fp = _round_up(d_ff, lane)

    scales = jnp.stack(
        [params["in_norm_scale"]]
        + [blk["norm_scale"] for blk in blocks]
        + [params["out_norm_scale"]]).astype(jnp.float32)          # [L+2, D]
    scales = jnp.pad(scales, ((0, 0), (0, dp - d_model)))

    # torch nn.Linear weight layout is (out_features, in_features):
    #   w_up: (2*d_ff, D)  -> value half rows [:d_ff], gate half rows [d_ff:]
    #   w_down: (D, d_ff)
    w_a = jnp.stack([blk["w_up"][:d_ff, :].T for blk in blocks])   # [L, D, d_ff]
    w_g = jnp.stack([blk["w_up"][d_ff:, :].T for blk in blocks])   # [L, D, d_ff]
    w_dn = jnp.stack([blk["w_down"].T for blk in blocks])          # [L, d_ff, D]
    w_a = jnp.pad(w_a, ((0, 0), (0, dp - d_model), (0, fp - d_ff)))
    w_g = jnp.pad(w_g, ((0, 0), (0, dp - d_model), (0, fp - d_ff)))
    w_dn = jnp.pad(w_dn, ((0, 0), (0, fp - d_ff), (0, dp - d_model)))

    return {
        "scales": scales, "w_a": w_a, "w_g": w_g, "w_down": w_dn,
        "n_layers": n_layers, "d_model": d_model, "d_ff": d_ff,
        "dp": dp, "fp": fp,
    }


def mapping_network_pallas(x, pp, eps=1e-6, *, tm=256):
    # x: [B, T, D]
    B, T, D = x.shape
    assert D == pp["d_model"]
    L, dp, fp = pp["n_layers"], pp["dp"], pp["fp"]

    N = B * T
    tm_eff = min(tm, _round_up(N, 8))          # big tile, but no waste on toy N
    Np = _round_up(N, tm_eff)

    x2d = x.reshape(N, D)
    x_pad = jnp.pad(x2d, ((0, Np - N), (0, dp - D)))

    kernel = functools.partial(_mapping_kernel, eps=eps, n_layers=L, d_model=D)

    itemsize = x.dtype.itemsize
    weight_bytes = (pp["w_a"].size + pp["w_g"].size + pp["w_down"].size) * itemsize
    act_bytes = tm_eff * dp * 4
    vmem_limit = int(min(64 * 1024 * 1024,
                         max(32 * 1024 * 1024,
                             2 * weight_bytes + 4 * act_bytes + (8 << 20))))

    out = pl.pallas_call(
        kernel,
        out_shape=jax.ShapeDtypeStruct((Np, dp), x.dtype),
        grid=(Np // tm_eff,),
        in_specs=[
            pl.BlockSpec((tm_eff, dp), lambda i: (i, 0)),       # activations
            pl.BlockSpec((L + 2, dp), lambda i: (0, 0)),        # norm scales
            pl.BlockSpec((L, dp, fp), lambda i: (0, 0, 0)),     # w_a (resident)
            pl.BlockSpec((L, dp, fp), lambda i: (0, 0, 0)),     # w_g (resident)
            pl.BlockSpec((L, fp, dp), lambda i: (0, 0, 0)),     # w_down (resident)
        ],
        out_specs=pl.BlockSpec((tm_eff, dp), lambda i: (i, 0)),
        compiler_params=pltpu.CompilerParams(
            dimension_semantics=("parallel",),
            vmem_limit_bytes=vmem_limit),
    )(x_pad, pp["scales"], pp["w_a"], pp["w_g"], pp["w_down"])

    return out[:N, :D].reshape(B, T, D)


# ----------------------------- pure-JAX reference -----------------------------


def _rms_norm_ref(x, scale, eps):
    xf = x.astype(jnp.float32)
    mean_sq = jnp.mean(xf * xf, axis=-1, keepdims=True)
    s = scale.astype(jnp.float32) * jax.lax.rsqrt(mean_sq + eps)
    return x * s.astype(x.dtype)


def mapping_network_ref(x, params, eps=1e-6):
    x = _rms_norm_ref(x, params["in_norm_scale"], eps)
    for blk in params["blocks"]:
        skip = x
        h = _rms_norm_ref(x, blk["norm_scale"], eps)
        u = h @ blk["w_up"].T
        d_ff = u.shape[-1] // 2
        a, g = u[..., :d_ff], u[..., d_ff:]
        h = a * (g * jax.nn.sigmoid(g))
        h = h @ blk["w_down"].T
        x = h + skip
    x = _rms_norm_ref(x, params["out_norm_scale"], eps)
    return x


# ----------------------------- params / main ----------------------------------


def make_params(key, n_layers, d_model, d_ff):
    params = {
        "in_norm_scale": jnp.ones((d_model,), jnp.float32),
        "out_norm_scale": jnp.ones((d_model,), jnp.float32),
        "blocks": [],
    }
    # NOTE: original module uses zero_init for down_proj; we use small random
    # weights so the kernel output is non-trivial (init is not forward semantics).
    for _ in range(n_layers):
        key, k1, k2 = jax.random.split(key, 3)
        params["blocks"].append({
            "norm_scale": jnp.ones((d_model,), jnp.float32),
            # torch nn.Linear weight layout: (out_features, in_features)
            "w_up": jax.random.normal(k1, (2 * d_ff, d_model), jnp.float32)
                    * (1.0 / jnp.sqrt(d_model)),
            "w_down": jax.random.normal(k2, (d_model, d_ff), jnp.float32)
                      * (0.02 / jnp.sqrt(d_ff)),
        })
    return params


if __name__ == "__main__":
    n_layers, d_model, d_ff = 2, 32, 64
    B, T = 2, 8

    key = jax.random.PRNGKey(0)
    key, kx = jax.random.split(key)
    x = jax.random.normal(kx, (B, T, d_model), jnp.float32)
    params = make_params(key, n_layers, d_model, d_ff)

    pallas_params = prepare_pallas_params(params)
    out = mapping_network_pallas(x, pallas_params)
    out = jax.block_until_ready(out)

    ref = mapping_network_ref(x, params)
    assert out.shape == (B, T, d_model)
    assert jnp.allclose(out, ref, atol=1e-5, rtol=1e-5), \
        float(jnp.max(jnp.abs(out - ref)))

    print("KERNEL_OK")
</pallas_src>

<mosaic_0001>
module attributes {stable_mosaic.version = 11 : i64} {
  func.func @_mapping_kernel(%arg0: i32, %arg1: memref<16x128xf32, #tpu.memory_space<vmem>>, %arg2: memref<4x128xf32, #tpu.memory_space<vmem>>, %arg3: memref<2x128x128xf32, #tpu.memory_space<vmem>>, %arg4: memref<2x128x128xf32, #tpu.memory_space<vmem>>, %arg5: memref<2x128x128xf32, #tpu.memory_space<vmem>>, %arg6: memref<16x128xf32, #tpu.memory_space<vmem>>) attributes {dimension_semantics = [#tpu.dimension_semantics<parallel>], iteration_bounds = array<i64: 1>, scalar_prefetch = 0 : i64, scratch_operands = 0 : i64, tpu.core_type = #tpu.core_type<tc>, window_params = [{transform_indices = @transform_0, window_bounds = array<i64: 16, 128>}, {pipeline_mode = #tpu.pipeline_mode<synchronous>, transform_indices = @transform_1, window_bounds = array<i64: 4, 128>}, {pipeline_mode = #tpu.pipeline_mode<synchronous>, transform_indices = @transform_2, window_bounds = array<i64: 2, 128, 128>}, {pipeline_mode = #tpu.pipeline_mode<synchronous>, transform_indices = @transform_3, window_bounds = array<i64: 2, 128, 128>}, {pipeline_mode = #tpu.pipeline_mode<synchronous>, transform_indices = @transform_4, window_bounds = array<i64: 2, 128, 128>}, {transform_indices = @transform_5, window_bounds = array<i64: 16, 128>}]} {
    %c0 = arith.constant 0 : index
    %c0_0 = arith.constant 0 : index
    %0 = vector.load %arg1[%c0, %c0_0] : memref<16x128xf32, #tpu.memory_space<vmem>>, vector<16x128xf32>
    %c0_1 = arith.constant 0 : index
    %c0_2 = arith.constant 0 : index
    %1 = vector.load %arg2[%c0_1, %c0_2] : memref<4x128xf32, #tpu.memory_space<vmem>>, vector<1x128xf32>
    %2 = arith.mulf %0, %0 : vector<16x128xf32>
    %cst = arith.constant dense<0.000000e+00> : vector<16xf32>
    %3 = vector.multi_reduction <add>, %2, %cst [1] : vector<16x128xf32> to vector<16xf32>
    %4 = vector.shape_cast %3 : vector<16xf32> to vector<16x1xf32>
    %cst_3 = arith.constant 3.125000e-02 : f32
    %5 = vector.broadcast %cst_3 : f32 to vector<16x1xf32>
    %6 = arith.mulf %4, %5 : vector<16x1xf32>
    %cst_4 = arith.constant 9.99999997E-7 : f32
    %7 = vector.broadcast %cst_4 : f32 to vector<16x1xf32>
    %8 = arith.addf %6, %7 : vector<16x1xf32>
    %9 = math.rsqrt %8 : vector<16x1xf32>
    %10 = vector.broadcast %1 : vector<1x128xf32> to vector<16x128xf32>
    %11 = vector.broadcast %9 : vector<16x1xf32> to vector<16x128xf32>
    %12 = arith.mulf %10, %11 : vector<16x128xf32>
    %13 = arith.mulf %0, %12 : vector<16x128xf32>
    %c1 = arith.constant 1 : index
    %c0_5 = arith.constant 0 : index
    %14 = vector.load %arg2[%c1, %c0_5] : memref<4x128xf32, #tpu.memory_space<vmem>>, vector<1x128xf32>
    %15 = arith.mulf %13, %13 : vector<16x128xf32>
    %cst_6 = arith.constant dense<0.000000e+00> : vector<16xf32>
    %16 = vector.multi_reduction <add>, %15, %cst_6 [1] : vector<16x128xf32> to vector<16xf32>
    %17 = vector.shape_cast %16 : vector<16xf32> to vector<16x1xf32>
    %cst_7 = arith.constant 3.125000e-02 : f32
    %18 = vector.broadcast %cst_7 : f32 to vector<16x1xf32>
    %19 = arith.mulf %17, %18 : vector<16x1xf32>
    %cst_8 = arith.constant 9.99999997E-7 : f32
    %20 = vector.broadcast %cst_8 : f32 to vector<16x1xf32>
    %21 = arith.addf %19, %20 : vector<16x1xf32>
    %22 = math.rsqrt %21 : vector<16x1xf32>
    %23 = vector.broadcast %14 : vector<1x128xf32> to vector<16x128xf32>
    %24 = vector.broadcast %22 : vector<16x1xf32> to vector<16x128xf32>
    %25 = arith.mulf %23, %24 : vector<16x128xf32>
    %26 = arith.mulf %13, %25 : vector<16x128xf32>
    %c0_9 = arith.constant 0 : index
    %c0_10 = arith.constant 0 : index
    %c0_11 = arith.constant 0 : index
    %27 = vector.load %arg3[%c0_9, %c0_10, %c0_11] : memref<2x128x128xf32, #tpu.memory_space<vmem>>, vector<1x128x128xf32>
    %28 = vector.shape_cast %27 : vector<1x128x128xf32> to vector<128x128xf32>
    %cst_12 = arith.constant dense<0.000000e+00> : vector<16x128xf32>
    %29 = tpu.matmul %26, %28, %cst_12 {dimension_numbers = #tpu.dot_dimension_numbers<[1], [0], [0], [1], [0, 0, 1, 1], [], []>} : vector<16x128xf32>, vector<128x128xf32>, vector<16x128xf32> -> vector<16x128xf32>
    %c0_13 = arith.constant 0 : index
    %c0_14 = arith.constant 0 : index
    %c0_15 = arith.constant 0 : index
    %30 = vector.load %arg4[%c0_13, %c0_14, %c0_15] : memref<2x128x128xf32, #tpu.memory_space<vmem>>, vector<1x128x128xf32>
    %31 = vector.shape_cast %30 : vector<1x128x128xf32> to vector<128x128xf32>
    %cst_16 = arith.constant dense<0.000000e+00> : vector<16x128xf32>
    %32 = tpu.matmul %26, %31, %cst_16 {dimension_numbers = #tpu.dot_dimension_numbers<[1], [0], [0], [1], [0, 0, 1, 1], [], []>} : vector<16x128xf32>, vector<128x128xf32>, vector<16x128xf32> -> vector<16x128xf32>
    %33 = arith.negf %32 : vector<16x128xf32>
    %34 = math.exp %33 : vector<16x128xf32>
    %cst_17 = arith.constant 1.000000e+00 : f32
    %35 = vector.broadcast %cst_17 : f32 to vector<16x128xf32>
    %36 = arith.addf %35, %34 : vector<16x128xf32>
    %37 = arith.divf %35, %36 : vector<16x128xf32>
    %38 = arith.mulf %32, %37 : vector<16x128xf32>
    %39 = arith.mulf %29, %38 : vector<16x128xf32>
    %c0_18 = arith.constant 0 : index
    %c0_19 = arith.constant 0 : index
    %c0_20 = arith.constant 0 : index
    %40 = vector.load %arg5[%c0_18, %c0_19, %c0_20] : memref<2x128x128xf32, #tpu.memory_space<vmem>>, vector<1x128x128xf32>
    %41 = vector.shape_cast %40 : vector<1x128x128xf32> to vector<128x128xf32>
    %cst_21 = arith.constant dense<0.000000e+00> : vector<16x128xf32>
    %42 = tpu.matmul %39, %41, %cst_21 {dimension_numbers = #tpu.dot_dimension_numbers<[1], [0], [0], [1], [0, 0, 1, 1], [], []>} : vector<16x128xf32>, vector<128x128xf32>, vector<16x128xf32> -> vector<16x128xf32>
    %43 = arith.addf %42, %13 : vector<16x128xf32>
    %c2 = arith.constant 2 : index
    %c0_22 = arith.constant 0 : index
    %44 = vector.load %arg2[%c2, %c0_22] : memref<4x128xf32, #tpu.memory_space<vmem>>, vector<1x128xf32>
    %45 = arith.mulf %43, %43 : vector<16x128xf32>
    %cst_23 = arith.constant dense<0.000000e+00> : vector<16xf32>
    %46 = vector.multi_reduction <add>, %45, %cst_23 [1] : vector<16x128xf32> to vector<16xf32>
    %47 = vector.shape_cast %46 : vector<16xf32> to vector<16x1xf32>
    %cst_24 = arith.constant 3.125000e-02 : f32
    %48 = vector.broadcast %cst_24 : f32 to vector<16x1xf32>
    %49 = arith.mulf %47, %48 : vector<16x1xf32>
    %cst_25 = arith.constant 9.99999997E-7 : f32
    %50 = vector.broadcast %cst_25 : f32 to vector<16x1xf32>
    %51 = arith.addf %49, %50 : vector<16x1xf32>
    %52 = math.rsqrt %51 : vector<16x1xf32>
    %53 = vector.broadcast %44 : vector<1x128xf32> to vector<16x128xf32>
    %54 = vector.broadcast %52 : vector<16x1xf32> to vector<16x128xf32>
    %55 = arith.mulf %53, %54 : vector<16x128xf32>
    %56 = arith.mulf %43, %55 : vector<16x128xf32>
    %c1_26 = arith.constant 1 : index
    %c0_27 = arith.constant 0 : index
    %c0_28 = arith.constant 0 : index
    %57 = vector.load %arg3[%c1_26, %c0_27, %c0_28] : memref<2x128x128xf32, #tpu.memory_space<vmem>>, vector<1x128x128xf32>
    %58 = vector.shape_cast %57 : vector<1x128x128xf32> to vector<128x128xf32>
    %cst_29 = arith.constant dense<0.000000e+00> : vector<16x128xf32>
    %59 = tpu.matmul %56, %58, %cst_29 {dimension_numbers = #tpu.dot_dimension_numbers<[1], [0], [0], [1], [0, 0, 1, 1], [], []>} : vector<16x128xf32>, vector<128x128xf32>, vector<16x128xf32> -> vector<16x128xf32>
    %c1_30 = arith.constant 1 : index
    %c0_31 = arith.constant 0 : index
    %c0_32 = arith.constant 0 : index
    %60 = vector.load %arg4[%c1_30, %c0_31, %c0_32] : memref<2x128x128xf32, #tpu.memory_space<vmem>>, vector<1x128x128xf32>
    %61 = vector.shape_cast %60 : vector<1x128x128xf32> to vector<128x128xf32>
    %cst_33 = arith.constant dense<0.000000e+00> : vector<16x128xf32>
    %62 = tpu.matmul %56, %61, %cst_33 {dimension_numbers = #tpu.dot_dimension_numbers<[1], [0], [0], [1], [0, 0, 1, 1], [], []>} : vector<16x128xf32>, vector<128x128xf32>, vector<16x128xf32> -> vector<16x128xf32>
    %63 = arith.negf %62 : vector<16x128xf32>
    %64 = math.exp %63 : vector<16x128xf32>
    %cst_34 = arith.constant 1.000000e+00 : f32
    %65 = vector.broadcast %cst_34 : f32 to vector<16x128xf32>
    %66 = arith.addf %65, %64 : vector<16x128xf32>
    %67 = arith.divf %65, %66 : vector<16x128xf32>
    %68 = arith.mulf %62, %67 : vector<16x128xf32>
    %69 = arith.mulf %59, %68 : vector<16x128xf32>
    %c1_35 = arith.constant 1 : index
    %c0_36 = arith.constant 0 : index
    %c0_37 = arith.constant 0 : index
    %70 = vector.load %arg5[%c1_35, %c0_36, %c0_37] : memref<2x128x128xf32, #tpu.memory_space<vmem>>, vector<1x128x128xf32>
    %71 = vector.shape_cast %70 : vector<1x128x128xf32> to vector<128x128xf32>
    %cst_38 = arith.constant dense<0.000000e+00> : vector<16x128xf32>
    %72 = tpu.matmul %69, %71, %cst_38 {dimension_numbers = #tpu.dot_dimension_numbers<[1], [0], [0], [1], [0, 0, 1, 1], [], []>} : vector<16x128xf32>, vector<128x128xf32>, vector<16x128xf32> -> vector<16x128xf32>
    %73 = arith.addf %72, %43 : vector<16x128xf32>
    %c3 = arith.constant 3 : index
    %c0_39 = arith.constant 0 : index
    %74 = vector.load %arg2[%c3, %c0_39] : memref<4x128xf32, #tpu.memory_space<vmem>>, vector<1x128xf32>
    %75 = arith.mulf %73, %73 : vector<16x128xf32>
    %cst_40 = arith.constant dense<0.000000e+00> : vector<16xf32>
    %76 = vector.multi_reduction <add>, %75, %cst_40 [1] : vector<16x128xf32> to vector<16xf32>
    %77 = vector.shape_cast %76 : vector<16xf32> to vector<16x1xf32>
    %cst_41 = arith.constant 3.125000e-02 : f32
    %78 = vector.broadcast %cst_41 : f32 to vector<16x1xf32>
    %79 = arith.mulf %77, %78 : vector<16x1xf32>
    %cst_42 = arith.constant 9.99999997E-7 : f32
    %80 = vector.broadcast %cst_42 : f32 to vector<16x1xf32>
    %81 = arith.addf %79, %80 : vector<16x1xf32>
    %82 = math.rsqrt %81 : vector<16x1xf32>
    %83 = vector.broadcast %74 : vector<1x128xf32> to vector<16x128xf32>
    %84 = vector.broadcast %82 : vector<16x1xf32> to vector<16x128xf32>
    %85 = arith.mulf %83, %84 : vector<16x128xf32>
    %86 = arith.mulf %73, %85 : vector<16x128xf32>
    %c0_43 = arith.constant 0 : index
    %c0_44 = arith.constant 0 : index
    %87 = vector.load %arg6[%c0_43, %c0_44] : memref<16x128xf32, #tpu.memory_space<vmem>>, vector<16x128xf32>
    tpu.vector_store %arg6[%c0_43, %c0_44], %86 {strides = array<i32>} : memref<16x128xf32, #tpu.memory_space<vmem>>, vector<16x128xf32>,
    return
  }
  func.func @transform_0(%arg0: i32) -> (i32, i32) {
    %c0_i32 = arith.constant 0 : i32
    %c0_i32_0 = arith.constant 0 : i32
    return %arg0, %c0_i32 : i32, i32
  }
  func.func @transform_1(%arg0: i32) -> (i32, i32) {
    %c0_i32 = arith.constant 0 : i32
    %c0_i32_0 = arith.constant 0 : i32
    %c0_i32_1 = arith.constant 0 : i32
    return %c0_i32, %c0_i32_0 : i32, i32
  }
  func.func @transform_2(%arg0: i32) -> (i32, i32, i32) {
    %c0_i32 = arith.constant 0 : i32
    %c0_i32_0 = arith.constant 0 : i32
    %c0_i32_1 = arith.constant 0 : i32
    %c0_i32_2 = arith.constant 0 : i32
    return %c0_i32, %c0_i32_0, %c0_i32_1 : i32, i32, i32
  }
  func.func @transform_3(%arg0: i32) -> (i32, i32, i32) {
    %c0_i32 = arith.constant 0 : i32
    %c0_i32_0 = arith.constant 0 : i32
    %c0_i32_1 = arith.constant 0 : i32
    %c0_i32_2 = arith.constant 0 : i32
    return %c0_i32, %c0_i32_0, %c0_i32_1 : i32, i32, i32
  }
  func.func @transform_4(%arg0: i32) -> (i32, i32, i32) {
    %c0_i32 = arith.constant 0 : i32
    %c0_i32_0 = arith.constant 0 : i32
    %c0_i32_1 = arith.constant 0 : i32
    %c0_i32_2 = arith.constant 0 : i32
    return %c0_i32, %c0_i32_0, %c0_i32_1 : i32, i32, i32
  }
  func.func @transform_5(%arg0: i32) -> (i32, i32) {
    %c0_i32 = arith.constant 0 : i32
    %c0_i32_0 = arith.constant 0 : i32
    return %arg0, %c0_i32 : i32, i32
  }
}

</mosaic_0001>

<bundles_post_ra>
// kernel: tpu_custom_call.1
= control target key start
LH: loop header
LB: loop body
LE: loop exit
PB: predicated region body
PF: predicated region fallthrough
CT: control target
= control target key end

     0   :  { %10 = vsyncpa [#allocation3], 0  ;;  %s914_s0 = inlined_call_operand.hbm [shape: f32[16,128], index: 0, kind: input, shape index: {}]   ;;  %s915_s1 = inlined_call_operand.hbm [shape: f32[4,128], index: 1, kind: input, shape index: {}]   ;;  %s916_s2 = inlined_call_operand.hbm [shape: f32[2,128,128], index: 2, kind: input, shape index: {}]   ;;  %s917_s3 = inlined_call_operand.hbm [shape: f32[2,128,128], index: 3, kind: input, shape index: {}]   ;;  %s918_s4 = inlined_call_operand.hbm [shape: f32[2,128,128], index: 4, kind: input, shape index: {}]   ;;  %s919_s5 = inlined_call_operand.hbm [shape: f32[16,128], index: 5, kind: output, shape index: {}]  }
   0x1   :  { %11 = vsyncpa [#allocation6], 0 }
   0x2   :  { %12 = vsyncpa [#allocation9], 0  ;;  %s32_s20 = sshll.u32 %s915_s1, 4  ;;  %s33_s20 = int_to_ptr.hbm [resolvable:$true] %s32_s20 }
   0x3   :  { %13 = vsyncpa [#allocation4], 0  ;;  %s819_s21 = smov [#allocation5]   ;;  %s55_s25 = sshll.u32 %s917_s3, 4  ;;  %s56_s25 = int_to_ptr.hbm [resolvable:$true] %s55_s25 }
   0x4   :  { %s34_s22 = sshll.u32 %s819_s21, 4  ;;  %s820_s26 = smov [#allocation8]   ;;  %s35_s22 = int_to_ptr.vmem [resolvable:$true] %s34_s22 }
   0x5   :  { %37 = dma.hbm_to_vmem [thread:$0]  %s33_s20, 64, %s35_s22, [#allocation6]  }
   0x6   :  { %s57_s27 = sshll.u32 %s820_s26, 4  ;;  %s18_s30 = sshll.u32 %s914_s0, 4  ;;  %s58_s27 = int_to_ptr.vmem [resolvable:$true] %s57_s27  ;;  %s19_s30 = int_to_ptr.hbm [resolvable:$true] %s18_s30 }
   0x7   :  { %s821_s1 = smov 128   ;;  %s822_s6 = smov 8  }
   0x8   :  { %63 = dma.hbm_to_vmem [thread:$0]  %s56_s25, 4096, %s58_s27, [#allocation9], %s821_s1, %s821_s1, %s822_s6  }
   0x9   :  { %s42_s9 = sshll.u32 %s916_s2, 4  ;;  %s823_s3 = smov [#allocation2]   ;;  %s43_s9 = int_to_ptr.hbm [resolvable:$true] %s42_s9 }
   0xa   :  { %s20_s10 = sshll.u32 %s823_s3, 4  ;;  %s824_s0 = smov [#allocation7]   ;;  %s21_s10 = int_to_ptr.vmem [resolvable:$true] %s20_s10 }
   0xb   :  { %26 = dma.hbm_to_vmem [thread:$0]  %s19_s30, 256, %s21_s10, [#allocation3], %s821_s1, %s821_s1, %s822_s6  }
   0xc   :  { %s44_s11 = sshll.u32 %s824_s0, 4  ;;  %s68_s14 = sshll.u32 %s918_s4, 4  ;;  %s45_s11 = int_to_ptr.vmem [resolvable:$true] %s44_s11  ;;  %s69_s14 = int_to_ptr.hbm [resolvable:$true] %s68_s14 }
   0xd   :  { %50 = dma.hbm_to_vmem [thread:$0]  %s43_s9, 4096, %s45_s11, [#allocation6], %s821_s1, %s821_s1, %s822_s6  }
   0xe   :  { %s825_s2 = smov [#allocation10]  }
   0xf   :  { %s70_s15 = sshll.u32 %s825_s2, 4  ;;  %s71_s15 = int_to_ptr.vmem [resolvable:$true] %s70_s15 }
  0x10   :  { %76 = dma.hbm_to_vmem [thread:$0]  %s69_s14, 4096, %s71_s15, [#allocation9], %s821_s1, %s821_s1, %s822_s6  }
  0x11   :  { %811 = dma.done.wait [#allocation3], 256  }
  0x12   :  { %812 = vsyncadd [#allocation3], 4294967040 }
  0x13   :  { %813 = dma.done.wait [#allocation6], 4160  }
  0x14   :  { %814 = vsyncadd [#allocation6], 4294963136 }
  0x15   :  { %815 = dma.done.wait [#allocation9], 8192  }
  0x16   :  { %816 = vsyncadd [#allocation9], 4294959104  ;;  %v97_v0 = vld [vmem:[#allocation2] sm:$0xff]  ;;  %v98_v2 = vld [vmem:[#allocation2 + $0x8] sm:$0xff]  ;;  %s826_s4 = smov [#allocation11]   ;;  %s572_s19 = sshll.u32 %s919_s5, 4  ;;  %s573_s19 = int_to_ptr.hbm [resolvable:$true] %s572_s19 }
  0x17   :  { %v100_v1 = vmul.f32 %v97_v0, %v97_v0  ;;  %v101_v3 = vmul.f32 %v98_v2, %v98_v2  ;;  %v186_v7 = vld [vmem:[#allocation7 + $0x78] sm:$0xff]  ;;  %v185_v9 = vld [vmem:[#allocation7 + $0x70] sm:$0xff]  ;;  %v184_v11 = vld [vmem:[#allocation7 + $0x68] sm:$0xff]  ;;  %s570_s16 = sshll.u32 %s826_s4, 4  ;;  %s571_s16 = int_to_ptr.vmem [resolvable:$true] %s570_s16 }
  0x18   :  { %v225_v8 = vld [vmem:[#allocation8 + $0x78] sm:$0xff]  ;;  %187 = vmatpush.msra.mxu0 %v186_v7  ;;  %v224_v10 = vld [vmem:[#allocation8 + $0x70] sm:$0xff]  ;;  %v223_v12 = vld [vmem:[#allocation8 + $0x68] sm:$0xff] }
  0x19   :  { %102 = vadd.xlane.f32.xlu0 %v100_v1  ;;  %226 = vmatpush.msra.mxu1 %v225_v8  ;;  %v631_v22 = vld [vmem:[#allocation5] ss:$0 sm:$0xff]  ;;  %v183_v37 = vld [vmem:[#allocation7 + $0x60] sm:$0xff]  ;;  %v181_v41 = vld [vmem:[#allocation7 + $0x50] sm:$0xff] }
  0x1a   :  { %188 = vmatpush.msra.mxu0 %v185_v9  ;;  %v222_v38 = vld [vmem:[#allocation8 + $0x60] sm:$0xff]  ;;  %v182_v39 = vld [vmem:[#allocation7 + $0x58] sm:$0xff]  ;;  %v220_v42 = vld [vmem:[#allocation8 + $0x50] sm:$0xff] }
  0x1b   :  { %227 = vmatpush.msra.mxu1 %v224_v10  ;;  %v221_v40 = vld [vmem:[#allocation8 + $0x58] sm:$0xff]  ;;  %v180_v43 = vld [vmem:[#allocation7 + $0x48] sm:$0xff]  ;;  %v179_v45 = vld [vmem:[#allocation7 + $0x40] sm:$0xff] }
  0x1c   :  { %189 = vmatpush.msra.mxu0 %v184_v11  ;;  %v219_v44 = vld [vmem:[#allocation8 + $0x48] sm:$0xff]  ;;  %v218_v46 = vld [vmem:[#allocation8 + $0x40] sm:$0xff]  ;;  %v178_v47 = vld [vmem:[#allocation7 + $0x38] sm:$0xff] }
  0x1d   :  { %228 = vmatpush.msra.mxu1 %v223_v12  ;;  %v217_v48 = vld [vmem:[#allocation8 + $0x38] sm:$0xff]  ;;  %v177_v49 = vld [vmem:[#allocation7 + $0x30] sm:$0xff]  ;;  %v176_v51 = vld [vmem:[#allocation7 + $0x28] sm:$0xff] }
  0x1e   :  { %190 = vmatpush.msra.mxu0 %v183_v37  ;;  %v216_v50 = vld [vmem:[#allocation8 + $0x30] sm:$0xff]  ;;  %v215_v52 = vld [vmem:[#allocation8 + $0x28] sm:$0xff]  ;;  %v175_v53 = vld [vmem:[#allocation7 + $0x20] sm:$0xff] }
  0x1f   :  { %229 = vmatpush.msra.mxu1 %v222_v38  ;;  %v214_v54 = vld [vmem:[#allocation8 + $0x20] sm:$0xff]  ;;  %v174_v55 = vld [vmem:[#allocation7 + $0x18] sm:$0xff]  ;;  %v173_v57 = vld [vmem:[#allocation7 + $0x10] sm:$0xff] }
  0x20   :  { %191 = vmatpush.msra.mxu0 %v182_v39  ;;  %v213_v56 = vld [vmem:[#allocation8 + $0x18] sm:$0xff]  ;;  %v212_v58 = vld [vmem:[#allocation8 + $0x10] sm:$0xff]  ;;  %v172_v59 = vld [vmem:[#allocation7 + $0x8] sm:$0xff] }
  0x21   :  { %104 = vadd.xlane.f32.xlu0 %v101_v3  ;;  %230 = vmatpush.msra.mxu1 %v221_v40  ;;  %v211_v60 = vld [vmem:[#allocation8 + $0x8] sm:$0xff]  ;;  %v171_v61 = vld [vmem:[#allocation7] sm:$0xff]  ;;  %v632_v11 = vld [vmem:[#allocation5 + $0x1] ss:$0 sm:$0xff] }
  0x22   :  { %192 = vmatpush.msra.mxu0 %v181_v41  ;;  %v210_v62 = vld [vmem:[#allocation8] sm:$0xff]  ;;  %v294_v38 = vld [vmem:[#allocation10 + $0x18] sm:$0xff]  ;;  %v293_v39 = vld [vmem:[#allocation10 + $0x10] sm:$0xff] }
  0x23   :  { %231 = vmatpush.msra.mxu1 %v220_v42  ;;  %v295_v37 = vld [vmem:[#allocation10 + $0x20] sm:$0xff]  ;;  %v292_v40 = vld [vmem:[#allocation10 + $0x8] sm:$0xff] }
  0x24   :  { %193 = vmatpush.msra.mxu0 %v180_v43  ;;  %v291_v41 = vld [vmem:[#allocation10] sm:$0xff] }
  0x25   :  { %232 = vmatpush.msra.mxu1 %v219_v44 }
  0x26   :  { %194 = vmatpush.msra.mxu0 %v179_v45 }
  0x27   :  { %233 = vmatpush.msra.mxu1 %v218_v46 }
  0x28   :  { %195 = vmatpush.msra.mxu0 %v178_v47 }
  0x29   :  { %234 = vmatpush.msra.mxu1 %v217_v48 }
  0x2a   :  { %196 = vmatpush.msra.mxu0 %v177_v49 }
  0x2b   :  { %235 = vmatpush.msra.mxu1 %v216_v50 }
  0x2c   :  { %197 = vmatpush.msra.mxu0 %v176_v51 }
  0x2d   :  { %236 = vmatpush.msra.mxu1 %v215_v52 }
  0x2e   :  { %198 = vmatpush.msra.mxu0 %v175_v53 }
  0x2f   :  { %237 = vmatpush.msra.mxu1 %v214_v54 }
  0x30   :  { %199 = vmatpush.msra.mxu0 %v174_v55 }
  0x31   :  { %238 = vmatpush.msra.mxu1 %v213_v56 }
  0x32   :  { %200 = vmatpush.msra.mxu0 %v173_v57 }
  0x33   :  { %239 = vmatpush.msra.mxu1 %v212_v58 }
  0x34   :  { %201 = vmatpush.msra.mxu0 %v172_v59 }
  0x35   :  { %240 = vmatpush.msra.mxu1 %v211_v60 }
  0x36   :  { %202 = vmatpush.msra.mxu0 %v171_v61 }
  0x37   :  { %241 = vmatpush.msra.mxu1 %v210_v62 }
  0x8c   :  { %v103_v4 = vpop.xlane.xlu0 %102 }
  0x8d   :  { %v106_v5 = vmul.f32 0.03125, %v103_v4 }
  0x8f   :  { %v108_v6 = vadd.f32 1e-06, %v106_v5 }
  0x91   :  { %635 = vrsqrt.f32 %v108_v6  ;;  %vm116_vm1 = vweird.f32 %v108_v6 }
  0x94   :  { %v105_v13 = vpop.xlane.xlu0 %104 }
  0x95   :  { %v107_v14 = vmul.f32 0.03125, %v105_v13 }
  0x97   :  { %v636_v15 = vpop.eup %635  ;;  %v109_v16 = vadd.f32 1e-06, %v107_v14 }
  0x98   :  { %v111_v17 = vmul.f32 %v636_v15, %v108_v6  ;;  %vm117_vm0 = vweird.f32 %v636_v15 }
  0x99   :  { %637 = vrsqrt.f32 %v109_v16  ;;  %vm118_vm2 = vmor %vm116_vm1, %vm117_vm0  ;;  %vm126_vm4 = vweird.f32 %v109_v16 }
  0x9a   :  { %v112_v18 = vmul.f32 %v636_v15, %v111_v17 }
  0x9c   :  { %v113_v19 = vmul.f32 0.5, %v112_v18 }
  0x9e   :  { %v114_v20 = vsub.f32 1.5, %v113_v19 }
  0x9f   :  { %v638_v21 = vpop.eup %637 }
  0xa0   :  { %v115_v23 = vmul.f32 %v636_v15, %v114_v20  ;;  %v121_v24 = vmul.f32 %v638_v21, %v109_v16  ;;  %vm127_vm3 = vweird.f32 %v638_v21 }
  0xa1   :  { %vm128_vm5 = vmor %vm126_vm4, %vm127_vm3 }
  0xa2   :  { %v122_v25 = vmul.f32 %v638_v21, %v121_v24  ;;  %v119_v26 = vsel %vm118_vm2, %v636_v15, %v115_v23  ;;  %v306_v24 = vld [vmem:[#allocation10 + $0x78] sm:$0xff] }
  0xa3   :  { %v131_v27 = vmul.f32 %v631_v22, %v119_v26  ;;  %307 = vmatpush.msra.mxu2 %v306_v24  ;;  %v304_v26 = vld [vmem:[#allocation10 + $0x68] sm:$0xff]  ;;  %v417_v24 = vld [vmem:[#allocation8 + $0xd0] sm:$0xff] }
  0xa4   :  { %v123_v28 = vmul.f32 0.5, %v122_v25  ;;  %v305_v25 = vld [vmem:[#allocation10 + $0x70] sm:$0xff] }
  0xa5   :  { %v884_v29 = vmul.f32 %v131_v27, %v97_v0  ;;  %308 = vmatpush.msra.mxu2 %v305_v25  ;;  %v303_v27 = vld [vmem:[#allocation10 + $0x60] sm:$0xff]  ;;  %v380_v25 = vld [vmem:[#allocation7 + $0xe8] sm:$0xff] }
  0xa6   :  { %v124_v30 = vsub.f32 1.5, %v123_v28  ;;  %v302_v28 = vld [vmem:[#allocation10 + $0x58] sm:$0xff] }
  0xa7   :  { %v136_v31 = vmul.f32 %v884_v29, %v884_v29  ;;  %309 = vmatpush.msra.mxu2 %v304_v26  ;;  %v416_v26 = vld [vmem:[#allocation8 + $0xc8] sm:$0xff] }
  0xa8   :  { %v125_v32 = vmul.f32 %v638_v21, %v124_v30  ;;  %v301_v30 = vld [vmem:[#allocation10 + $0x50] sm:$0xff] }
  0xa9   :  { %138 = vadd.xlane.f32.xlu1 %v136_v31  ;;  %310 = vmatpush.msra.mxu2 %v303_v27  ;;  %v300_v31 = vld [vmem:[#allocation10 + $0x48] sm:$0xff]  ;;  %v415_v27 = vld [vmem:[#allocation8 + $0xc0] sm:$0xff] }
  0xaa   :  { %v129_v33 = vsel %vm128_vm5, %v638_v21, %v125_v32  ;;  %v299_v32 = vld [vmem:[#allocation10 + $0x40] sm:$0xff] }
  0xab   :  { %v132_v34 = vmul.f32 %v631_v22, %v129_v33  ;;  %311 = vmatpush.msra.mxu2 %v302_v28  ;;  %v298_v33 = vld [vmem:[#allocation10 + $0x38] sm:$0xff] }
  0xac   :  { %v378_v28 = vld [vmem:[#allocation7 + $0xd8] sm:$0xff] }
  0xad   :  { %v888_v35 = vmul.f32 %v132_v34, %v98_v2  ;;  %312 = vmatpush.msra.mxu2 %v301_v30  ;;  %v297_v34 = vld [vmem:[#allocation10 + $0x30] sm:$0xff]  ;;  %v414_v30 = vld [vmem:[#allocation8 + $0xb8] sm:$0xff] }
  0xaf   :  { %v137_v36 = vmul.f32 %v888_v35, %v888_v35  ;;  %313 = vmatpush.msra.mxu2 %v300_v31  ;;  %v377_v31 = vld [vmem:[#allocation7 + $0xd0] sm:$0xff] }
  0xb1   :  { %140 = vadd.xlane.f32.xlu1 %v137_v36  ;;  %314 = vmatpush.msra.mxu2 %v299_v32  ;;  %v296_v36 = vld [vmem:[#allocation10 + $0x28] sm:$0xff]  ;;  %v413_v32 = vld [vmem:[#allocation8 + $0xb0] sm:$0xff] }
  0xb3   :  { %315 = vmatpush.msra.mxu2 %v298_v33  ;;  %v376_v33 = vld [vmem:[#allocation7 + $0xc8] sm:$0xff] }
  0xb5   :  { %316 = vmatpush.msra.mxu2 %v297_v34  ;;  %v412_v34 = vld [vmem:[#allocation8 + $0xa8] sm:$0xff] }
  0xb7   :  { %317 = vmatpush.msra.mxu2 %v296_v36  ;;  %v375_v36 = vld [vmem:[#allocation7 + $0xc0] sm:$0xff] }
  0xb9   :  { %318 = vmatpush.msra.mxu2 %v295_v37  ;;  %v411_v37 = vld [vmem:[#allocation8 + $0xa0] sm:$0xff] }
  0xbb   :  { %319 = vmatpush.msra.mxu2 %v294_v38  ;;  %v374_v38 = vld [vmem:[#allocation7 + $0xb8] sm:$0xff] }
  0xbd   :  { %320 = vmatpush.msra.mxu2 %v293_v39  ;;  %v410_v39 = vld [vmem:[#allocation8 + $0x98] sm:$0xff] }
  0xbf   :  { %321 = vmatpush.msra.mxu2 %v292_v40  ;;  %v373_v40 = vld [vmem:[#allocation7 + $0xb0] sm:$0xff] }
  0xc1   :  { %322 = vmatpush.msra.mxu2 %v291_v41  ;;  %v409_v41 = vld [vmem:[#allocation8 + $0x90] sm:$0xff] }
 0x11c   :  { %v139_v63 = vpop.xlane.xlu1 %138 }
 0x11d   :  { %v142_v0 = vmul.f32 0.03125, %v139_v63 }
 0x11f   :  { %v144_v1 = vadd.f32 1e-06, %v142_v0 }
 0x121   :  { %639 = vrsqrt.f32 %v144_v1  ;;  %vm152_vm7 = vweird.f32 %v144_v1 }
 0x124   :  { %v141_v2 = vpop.xlane.xlu1 %140 }
 0x125   :  { %v143_v3 = vmul.f32 0.03125, %v141_v2 }
 0x127   :  { %v640_v4 = vpop.eup %639  ;;  %v145_v5 = vadd.f32 1e-06, %v143_v3 }
 0x128   :  { %v147_v6 = vmul.f32 %v640_v4, %v144_v1  ;;  %vm153_vm6 = vweird.f32 %v640_v4 }
 0x129   :  { %641 = vrsqrt.f32 %v145_v5  ;;  %vm154_vm8 = vmor %vm152_vm7, %vm153_vm6  ;;  %vm162_vm10 = vweird.f32 %v145_v5 }
 0x12a   :  { %v148_v7 = vmul.f32 %v640_v4, %v147_v6 }
 0x12c   :  { %v149_v8 = vmul.f32 0.5, %v148_v7 }
 0x12e   :  { %v150_v9 = vsub.f32 1.5, %v149_v8 }
 0x12f   :  { %v642_v10 = vpop.eup %641 }
 0x130   :  { %v157_v12 = vmul.f32 %v642_v10, %v145_v5  ;;  %v151_v13 = vmul.f32 %v640_v4, %v150_v9  ;;  %vm163_vm9 = vweird.f32 %v642_v10 }
 0x131   :  { %vm164_vm11 = vmor %vm162_vm10, %vm163_vm9 }
 0x132   :  { %v158_v14 = vmul.f32 %v642_v10, %v157_v12  ;;  %v155_v15 = vsel %vm154_vm8, %v640_v4, %v151_v13  ;;  %v422_v12 = vld [vmem:[#allocation8 + $0xf8] sm:$0xff]  ;;  %v421_v13 = vld [vmem:[#allocation8 + $0xf0] sm:$0xff] }
 0x133   :  { %v167_v16 = vmul.f32 %v632_v11, %v155_v15  ;;  %591 = vmatpush.msrb.mxu2 %v422_v12  ;;  %423 = vmatpush.msrb.mxu0 %v422_v12  ;;  %v503_v12 = vld [vmem:[#allocation10 + $0xf0] sm:$0xff] }
 0x134   :  { %v159_v17 = vmul.f32 0.5, %v158_v14  ;;  %v420_v14 = vld [vmem:[#allocation8 + $0xe8] sm:$0xff] }
 0x135   :  { %v169_v18 = vmul.f32 %v167_v16, %v884_v29  ;;  %592 = vmatpush.msrb.mxu2 %v421_v13  ;;  %424 = vmatpush.msrb.mxu0 %v421_v13  ;;  %v502_v13 = vld [vmem:[#allocation10 + $0xe8] sm:$0xff] }
 0x136   :  { %v160_v19 = vsub.f32 1.5, %v159_v17 }
 0x137   :  { %203 = vmatmul.f32.vlgmr.msra.gmra.mxu0 %v169_v18  ;;  %242 = vmatmul.f32.vlgmr.msra.gmra.mxu1 %v169_v18 }
 0x138   :  { %v161_v20 = vmul.f32 %v642_v10, %v160_v19  ;;  %593 = vmatpush.msrb.mxu2 %v420_v14  ;;  %425 = vmatpush.msrb.mxu0 %v420_v14  ;;  %v501_v14 = vld [vmem:[#allocation10 + $0xe0] sm:$0xff] }
 0x13a   :  { %v165_v21 = vsel %vm164_vm11, %v642_v10, %v161_v20 }
 0x13b   :  { %v168_v22 = vmul.f32 %v632_v11, %v165_v21  ;;  %v419_v21 = vld [vmem:[#allocation8 + $0xe0] sm:$0xff] }
 0x13c   :  { %594 = vmatpush.msrb.mxu2 %v419_v21  ;;  %426 = vmatpush.msrb.mxu0 %v419_v21  ;;  %v496_v21 = vld [vmem:[#allocation10 + $0xb8] sm:$0xff] }
 0x13d   :  { %v170_v23 = vmul.f32 %v168_v22, %v888_v35  ;;  %v382_v22 = vld [vmem:[#allocation7 + $0xf8] sm:$0xff] }
 0x13e   :  { %383 = vmatpush.msra.mxu3 %v382_v22  ;;  %v495_v22 = vld [vmem:[#allocation10 + $0xb0] sm:$0xff] }
 0x13f   :  { %206 = vmatmul.f32.gmra.mxu0 %v170_v23  ;;  %245 = vmatmul.f32.gmra.mxu1 %v170_v23  ;;  %v418_v23 = vld [vmem:[#allocation8 + $0xd8] sm:$0xff] }
 0x140   :  { %595 = vmatpush.msrb.mxu2 %v418_v23  ;;  %427 = vmatpush.msrb.mxu0 %v418_v23  ;;  %v494_v23 = vld [vmem:[#allocation10 + $0xa8] sm:$0xff] }
 0x142   :  { %596 = vmatpush.msrb.mxu2 %v417_v24  ;;  %428 = vmatpush.msrb.mxu0 %v417_v24  ;;  %v492_v24 = vld [vmem:[#allocation10 + $0x98] sm:$0xff] }
 0x144   :  { %597 = vmatpush.msrb.mxu2 %v416_v26  ;;  %429 = vmatpush.msrb.mxu0 %v416_v26  ;;  %v490_v26 = vld [vmem:[#allocation10 + $0x88] sm:$0xff] }
 0x146   :  { %598 = vmatpush.msrb.mxu2 %v415_v27  ;;  %430 = vmatpush.msrb.mxu0 %v415_v27  ;;  %v489_v27 = vld [vmem:[#allocation10 + $0x80] sm:$0xff] }
 0x148   :  { %599 = vmatpush.msrb.mxu2 %v414_v30  ;;  %431 = vmatpush.msrb.mxu0 %v414_v30 }
 0x14a   :  { %600 = vmatpush.msrb.mxu2 %v413_v32  ;;  %432 = vmatpush.msrb.mxu0 %v413_v32 }
 0x14c   :  { %601 = vmatpush.msrb.mxu2 %v412_v34  ;;  %433 = vmatpush.msrb.mxu0 %v412_v34 }
 0x14e   :  { %602 = vmatpush.msrb.mxu2 %v411_v37  ;;  %434 = vmatpush.msrb.mxu0 %v411_v37 }
 0x150   :  { %603 = vmatpush.msrb.mxu2 %v410_v39  ;;  %435 = vmatpush.msrb.mxu0 %v410_v39 }
 0x152   :  { %604 = vmatpush.msrb.mxu2 %v409_v41  ;;  %436 = vmatpush.msrb.mxu0 %v409_v41 }
 0x1b4   :  { %v243_v42 = vpop.f32.mrf.mxu1  ;;  %v204_v61 = vpop.f32.mrf.mxu0 }
 0x1b5   :  { %v587_v43 = vmul.f32 -1.442695, %v243_v42 }
 0x1b7   :  { %643 = vpow2.f32 %v587_v43  ;;  %v408_v43 = vld [vmem:[#allocation8 + $0x88] sm:$0xff] }
 0x1b8   :  { %605 = vmatpush.msrb.mxu2 %v408_v43  ;;  %437 = vmatpush.msrb.mxu0 %v408_v43 }
 0x1bc   :  { %v246_v44 = vpop.f32.mrf.mxu1  ;;  %v207_v10 = vpop.f32.mrf.mxu0 }
 0x1bd   :  { %v644_v45 = vpop.eup %643  ;;  %v588_v46 = vmul.f32 -1.442695, %v246_v44 }
 0x1be   :  { %v255_v47 = vadd.f32 1.0, %v644_v45  ;;  %v407_v45 = vld [vmem:[#allocation8 + $0x80] sm:$0xff] }
 0x1bf   :  { %645 = vpow2.f32 %v588_v46  ;;  %606 = vmatpush.msrb.mxu2 %v407_v45  ;;  %v370_v46 = vld [vmem:[#allocation7 + $0x98] sm:$0xff]  ;;  %438 = vmatpush.msrb.mxu0 %v407_v45 }
 0x1c0   :  { %647 = vrcp.f32 %v255_v47  ;;  %v268_v53 = vand.u32 2147483648, %v255_v47  ;;  %v266_v55 = vand.u32 2147483647, %v255_v47  ;;  %vm262_vm13 = vweird.f32 %v255_v47 }
 0x1c2   :  { %v269_v58 = vor.u32 1.1754944e-38, %v268_v53  ;;  %vm267_vm15 = vcmp.eq.f32.partialorder %v266_v55, 8.507059e+37 }
 0x1c5   :  { %v646_v48 = vpop.eup %645 }
 0x1c6   :  { %v648_v49 = vpop.eup %647  ;;  %v256_v50 = vadd.f32 1.0, %v646_v48  ;;  %v368_v48 = vld [vmem:[#allocation7 + $0x88] sm:$0xff] }
 0x1c7   :  { %v258_v51 = vmul.f32 %v648_v49, %v255_v47  ;;  %vm263_vm12 = vweird.f32 %v648_v49  ;;  %v369_v47 = vld [vmem:[#allocation7 + $0x90] sm:$0xff] }
 0x1c8   :  { %649 = vrcp.f32 %v256_v50  ;;  %vm264_vm14 = vmor %vm262_vm13, %vm263_vm12  ;;  %v283_v1 = vand.u32 2147483648, %v256_v50  ;;  %v281_v3 = vand.u32 2147483647, %v256_v50  ;;  %vm277_vm1 = vweird.f32 %v256_v50 }
 0x1c9   :  { %v259_v52 = vsub.f32 1.0, %v258_v51 }
 0x1ca   :  { %v284_v6 = vor.u32 1.1754944e-38, %v283_v1  ;;  %vm282_vm3 = vcmp.eq.f32.partialorder %v281_v3, 8.507059e+37 }
 0x1cb   :  { %v260_v54 = vmul.f32 %v648_v49, %v259_v52 }
 0x1cd   :  { %v261_v56 = vadd.f32 %v648_v49, %v260_v54 }
 0x1ce   :  { %v650_v57 = vpop.eup %649 }
 0x1cf   :  { %v265_v59 = vsel %vm264_vm14, %v648_v49, %v261_v56  ;;  %v273_v60 = vmul.f32 %v650_v57, %v256_v50  ;;  %vm278_vm0 = vweird.f32 %v650_v57  ;;  %v367_v49 = vld [vmem:[#allocation7 + $0x80] sm:$0xff] }
 0x1d0   :  { %v270_v62 = vsel %vm267_vm15, %v269_v58, %v265_v59  ;;  %vm279_vm2 = vmor %vm277_vm1, %vm278_vm0 }
 0x1d1   :  { %v287_v63 = vmul.f32 %v270_v62, %v243_v42  ;;  %v274_v0 = vsub.f32 1.0, %v273_v60  ;;  %v372_v42 = vld [vmem:[#allocation7 + $0xa8] sm:$0xff]  ;;  %v633_v62 = vld [vmem:[#allocation5 + $0x2] ss:$0 sm:$0xff] }
 0x1d3   :  { %v275_v2 = vmul.f32 %v650_v57, %v274_v0  ;;  %v289_v4 = vmul.f32 %v287_v63, %v204_v61 }
 0x1d5   :  { %v276_v5 = vadd.f32 %v650_v57, %v275_v2  ;;  %323 = vmatmul.f32.vlgmr.msra.gmra.mxu2 %v289_v4 }
 0x1d7   :  { %v280_v7 = vsel %vm279_vm2, %v650_v57, %v276_v5 }
 0x1d8   :  { %v285_v8 = vsel %vm282_vm3, %v284_v6, %v280_v7 }
 0x1d9   :  { %v288_v9 = vmul.f32 %v285_v8, %v246_v44  ;;  %v371_v44 = vld [vmem:[#allocation7 + $0xa0] sm:$0xff] }
 0x1db   :  { %v290_v11 = vmul.f32 %v288_v9, %v207_v10 }
 0x1dd   :  { %326 = vmatmul.f32.gmra.mxu2 %v290_v11  ;;  %v504_v11 = vld [vmem:[#allocation10 + $0xf8] sm:$0xff] }
 0x1de   :  { %505 = vmatpush.msrb.mxu1 %v504_v11 }
 0x1e0   :  { %506 = vmatpush.msrb.mxu1 %v503_v12 }
 0x1e2   :  { %507 = vmatpush.msrb.mxu1 %v502_v13 }
 0x1e4   :  { %508 = vmatpush.msrb.mxu1 %v501_v14 }
 0x258   :  { %v324_v15 = vpop.f32.mrf.mxu2 }
 0x259   :  { %v900_v19 = vadd.f32 %v324_v15, %v884_v29  ;;  %v379_v29 = vld [vmem:[#allocation7 + $0xe0] sm:$0xff]  ;;  %v500_v15 = vld [vmem:[#allocation10 + $0xd8] sm:$0xff] }
 0x25a   :  { %509 = vmatpush.msrb.mxu1 %v500_v15 }
 0x25b   :  { %v331_v20 = vmul.f32 %v900_v19, %v900_v19 }
 0x260   :  { %v327_v16 = vpop.f32.mrf.mxu2 }
 0x261   :  { %v895_v17 = vadd.f32 %v327_v16, %v888_v35  ;;  %v381_v35 = vld [vmem:[#allocation7 + $0xf0] sm:$0xff] }
 0x262   :  { %384 = vmatpush.msra.mxu3 %v381_v35  ;;  %v499_v16 = vld [vmem:[#allocation10 + $0xd0] sm:$0xff]  ;;  %v493_v35 = vld [vmem:[#allocation10 + $0xa0] sm:$0xff] }
 0x263   :  { %v332_v18 = vmul.f32 %v895_v17, %v895_v17  ;;  %510 = vmatpush.msrb.mxu1 %v499_v16 }
 0x264   :  { %385 = vmatpush.msra.mxu3 %v380_v25  ;;  %v491_v25 = vld [vmem:[#allocation10 + $0x90] sm:$0xff] }
 0x265   :  { %335 = vadd.xlane.f32.xlu2 %v332_v18  ;;  %v498_v18 = vld [vmem:[#allocation10 + $0xc8] sm:$0xff] }
 0x266   :  { %386 = vmatpush.msra.mxu3 %v379_v29  ;;  %511 = vmatpush.msrb.mxu1 %v498_v18 }
 0x268   :  { %387 = vmatpush.msra.mxu3 %v378_v28 }
 0x26a   :  { %388 = vmatpush.msra.mxu3 %v377_v31 }
 0x26c   :  { %389 = vmatpush.msra.mxu3 %v376_v33 }
 0x26d   :  { %333 = vadd.xlane.f32.xlu2 %v331_v20  ;;  %v497_v20 = vld [vmem:[#allocation10 + $0xc0] sm:$0xff] }
 0x26e   :  { %390 = vmatpush.msra.mxu3 %v375_v36  ;;  %512 = vmatpush.msrb.mxu1 %v497_v20 }
 0x270   :  { %391 = vmatpush.msra.mxu3 %v374_v38  ;;  %513 = vmatpush.msrb.mxu1 %v496_v21 }
 0x272   :  { %392 = vmatpush.msra.mxu3 %v373_v40  ;;  %514 = vmatpush.msrb.mxu1 %v495_v22 }
 0x274   :  { %393 = vmatpush.msra.mxu3 %v372_v42  ;;  %515 = vmatpush.msrb.mxu1 %v494_v23 }
 0x276   :  { %394 = vmatpush.msra.mxu3 %v371_v44  ;;  %516 = vmatpush.msrb.mxu1 %v493_v35 }
 0x278   :  { %395 = vmatpush.msra.mxu3 %v370_v46  ;;  %517 = vmatpush.msrb.mxu1 %v492_v24 }
 0x27a   :  { %396 = vmatpush.msra.mxu3 %v369_v47  ;;  %518 = vmatpush.msrb.mxu1 %v491_v25 }
 0x27c   :  { %397 = vmatpush.msra.mxu3 %v368_v48  ;;  %519 = vmatpush.msrb.mxu1 %v490_v26 }
 0x27e   :  { %398 = vmatpush.msra.mxu3 %v367_v49  ;;  %520 = vmatpush.msrb.mxu1 %v489_v27 }
 0x280   :  { %607 = vmatpush.msrb.mxu3 %v504_v11 }
 0x282   :  { %608 = vmatpush.msrb.mxu3 %v503_v12 }
 0x284   :  { %609 = vmatpush.msrb.mxu3 %v502_v13 }
 0x286   :  { %610 = vmatpush.msrb.mxu3 %v501_v14 }
 0x288   :  { %611 = vmatpush.msrb.mxu3 %v500_v15 }
 0x28a   :  { %612 = vmatpush.msrb.mxu3 %v499_v16 }
 0x28c   :  { %613 = vmatpush.msrb.mxu3 %v498_v18 }
 0x28e   :  { %614 = vmatpush.msrb.mxu3 %v497_v20 }
 0x290   :  { %615 = vmatpush.msrb.mxu3 %v496_v21 }
 0x292   :  { %616 = vmatpush.msrb.mxu3 %v495_v22 }
 0x294   :  { %617 = vmatpush.msrb.mxu3 %v494_v23 }
 0x296   :  { %618 = vmatpush.msrb.mxu3 %v493_v35 }
 0x298   :  { %619 = vmatpush.msrb.mxu3 %v492_v24 }
 0x29a   :  { %620 = vmatpush.msrb.mxu3 %v491_v25 }
 0x29c   :  { %621 = vmatpush.msrb.mxu3 %v490_v26 }
 0x29e   :  { %622 = vmatpush.msrb.mxu3 %v489_v27 }
 0x2d8   :  { %v336_v50 = vpop.xlane.xlu2 %335 }
 0x2d9   :  { %v338_v51 = vmul.f32 0.03125, %v336_v50 }
 0x2db   :  { %v340_v52 = vadd.f32 1e-06, %v338_v51 }
 0x2dd   :  { %651 = vrsqrt.f32 %v340_v52  ;;  %vm357_vm5 = vweird.f32 %v340_v52 }
 0x2e0   :  { %v334_v53 = vpop.xlane.xlu2 %333 }
 0x2e1   :  { %v337_v54 = vmul.f32 0.03125, %v334_v53 }
 0x2e3   :  { %v652_v55 = vpop.eup %651  ;;  %v339_v56 = vadd.f32 1e-06, %v337_v54 }
 0x2e4   :  { %v352_v57 = vmul.f32 %v652_v55, %v340_v52  ;;  %vm358_vm4 = vweird.f32 %v652_v55 }
 0x2e5   :  { %653 = vrsqrt.f32 %v339_v56  ;;  %vm359_vm6 = vmor %vm357_vm5, %vm358_vm4  ;;  %vm347_vm8 = vweird.f32 %v339_v56 }
 0x2e6   :  { %v353_v58 = vmul.f32 %v652_v55, %v352_v57 }
 0x2e8   :  { %v354_v59 = vmul.f32 0.5, %v353_v58 }
 0x2ea   :  { %v355_v60 = vsub.f32 1.5, %v354_v59 }
 0x2eb   :  { %v654_v61 = vpop.eup %653 }
 0x2ec   :  { %v356_v63 = vmul.f32 %v652_v55, %v355_v60  ;;  %v342_v0 = vmul.f32 %v654_v61, %v339_v56  ;;  %vm348_vm7 = vweird.f32 %v654_v61 }
 0x2ed   :  { %vm349_vm9 = vmor %vm347_vm8, %vm348_vm7 }
 0x2ee   :  { %v343_v1 = vmul.f32 %v654_v61, %v342_v0  ;;  %v360_v2 = vsel %vm359_vm6, %v652_v55, %v356_v63 }
 0x2ef   :  { %v363_v3 = vmul.f32 %v633_v62, %v360_v2 }
 0x2f0   :  { %v344_v4 = vmul.f32 0.5, %v343_v1 }
 0x2f1   :  { %v365_v5 = vmul.f32 %v363_v3, %v895_v17 }
 0x2f2   :  { %v345_v6 = vsub.f32 1.5, %v344_v4 }
 0x2f3   :  { %442 = vmatmul.f32.vlgmr.msrb.gmra.mxu2 %v365_v5 }
 0x2f4   :  { %v346_v7 = vmul.f32 %v654_v61, %v345_v6 }
 0x2f6   :  { %v350_v8 = vsel %vm349_vm9, %v654_v61, %v346_v7 }
 0x2f7   :  { %v362_v9 = vmul.f32 %v633_v62, %v350_v8 }
 0x2f9   :  { %v364_v10 = vmul.f32 %v362_v9, %v900_v19 }
 0x2fb   :  { %399 = vmatmul.f32.vlgmr.msra.gmra.mxu3 %v364_v10  ;;  %439 = vmatmul.f32.vlgmr.msrb.gmra.mxu0 %v364_v10 }
 0x303   :  { %402 = vmatmul.f32.gmra.mxu3 %v365_v5 }
 0x376   :  { %v443_v29 = vpop.f32.mrf.mxu2 }
 0x377   :  { %v590_v28 = vmul.f32 -1.442695, %v443_v29 }
 0x378   :  { %v440_v30 = vpop.f32.mrf.mxu0 }
 0x379   :  { %655 = vpow2.f32 %v590_v28  ;;  %v589_v31 = vmul.f32 -1.442695, %v440_v30 }
 0x37b   :  { %657 = vpow2.f32 %v589_v31 }
 0x37e   :  { %v400_v39 = vpop.f32.mrf.mxu3 }
 0x37f   :  { %v656_v32 = vpop.eup %655 }
 0x380   :  { %v453_v33 = vadd.f32 1.0, %v656_v32 }
 0x381   :  { %v658_v34 = vpop.eup %657 }
 0x382   :  { %659 = vrcp.f32 %v453_v33  ;;  %v452_v36 = vadd.f32 1.0, %v658_v34  ;;  %v480_v42 = vand.u32 2147483648, %v453_v33  ;;  %v478_v45 = vand.u32 2147483647, %v453_v33 }
 0x383   :  { %vm474_vm11 = vweird.f32 %v453_v33 }
 0x384   :  { %661 = vrcp.f32 %v452_v36  ;;  %v465_v48 = vand.u32 2147483648, %v452_v36  ;;  %v481_v49 = vor.u32 1.1754944e-38, %v480_v42  ;;  %v463_v51 = vand.u32 2147483647, %v452_v36 }
 0x385   :  { %vm479_vm14 = vcmp.eq.f32.partialorder %v478_v45, 8.507059e+37  ;;  %vm459_vm15 = vweird.f32 %v452_v36 }
 0x386   :  { %v466_v56 = vor.u32 1.1754944e-38, %v465_v48  ;;  %vm464_vm1 = vcmp.eq.f32.partialorder %v463_v51, 8.507059e+37  ;;  %v403_v58 = vpop.f32.mrf.mxu3 }
 0x388   :  { %v660_v37 = vpop.eup %659 }
 0x389   :  { %v470_v38 = vmul.f32 %v660_v37, %v453_v33  ;;  %vm475_vm10 = vweird.f32 %v660_v37 }
 0x38a   :  { %v662_v40 = vpop.eup %661  ;;  %vm476_vm12 = vmor %vm474_vm11, %vm475_vm10 }
 0x38b   :  { %v471_v41 = vsub.f32 1.0, %v470_v38  ;;  %v455_v43 = vmul.f32 %v662_v40, %v452_v36  ;;  %vm460_vm13 = vweird.f32 %v662_v40 }
 0x38c   :  { %vm461_vm0 = vmor %vm459_vm15, %vm460_vm13 }
 0x38d   :  { %v472_v44 = vmul.f32 %v660_v37, %v471_v41  ;;  %v456_v46 = vsub.f32 1.0, %v455_v43 }
 0x38f   :  { %v473_v47 = vadd.f32 %v660_v37, %v472_v44  ;;  %v457_v50 = vmul.f32 %v662_v40, %v456_v46 }
 0x391   :  { %v477_v52 = vsel %vm476_vm12, %v660_v37, %v473_v47  ;;  %v458_v54 = vadd.f32 %v662_v40, %v457_v50 }
 0x392   :  { %v482_v53 = vsel %vm479_vm14, %v481_v49, %v477_v52 }
 0x393   :  { %v485_v55 = vmul.f32 %v482_v53, %v443_v29  ;;  %v462_v57 = vsel %vm461_vm0, %v662_v40, %v458_v54 }
 0x394   :  { %v467_v59 = vsel %vm464_vm1, %v466_v56, %v462_v57 }
 0x395   :  { %v487_v60 = vmul.f32 %v485_v55, %v403_v58  ;;  %v484_v61 = vmul.f32 %v467_v59, %v440_v30 }
 0x397   :  { %524 = vmatmul.f32.vlgmr.msrb.gmra.mxu3 %v487_v60  ;;  %v486_v62 = vmul.f32 %v484_v61, %v400_v39 }
 0x399   :  { %521 = vmatmul.f32.vlgmr.msrb.gmra.mxu1 %v486_v62 }
 0x416   :  { %v522_v63 = vpop.f32.mrf.mxu1 }
 0x417   :  { %v523_v0 = vadd.f32 %v522_v63, %v900_v19 }
 0x419   :  { %v529_v2 = vmul.f32 %v523_v0, %v523_v0 }
 0x41a   :  { %v525_v1 = vpop.f32.mrf.mxu3 }
 0x41b   :  { %v526_v3 = vadd.f32 %v525_v1, %v895_v17  ;;  %531 = vadd.xlane.f32.xlu0 %v529_v2  ;;  %v634_v17 = vld [vmem:[#allocation5 + $0x3] ss:$0 sm:$0xff] }
 0x41d   :  { %v530_v4 = vmul.f32 %v526_v3, %v526_v3 }
 0x41f   :  { %533 = vadd.xlane.f32.xlu1 %v530_v4 }
 0x48e   :  { %v532_v5 = vpop.xlane.xlu0 %531 }
 0x48f   :  { %v535_v6 = vmul.f32 0.03125, %v532_v5 }
 0x491   :  { %v537_v7 = vadd.f32 1e-06, %v535_v6 }
 0x492   :  { %v534_v8 = vpop.xlane.xlu1 %533 }
 0x493   :  { %v536_v9 = vmul.f32 0.03125, %v534_v8  ;;  %663 = vrsqrt.f32 %v537_v7  ;;  %vm545_vm3 = vweird.f32 %v537_v7 }
 0x495   :  { %v538_v10 = vadd.f32 1e-06, %v536_v9 }
 0x497   :  { %665 = vrsqrt.f32 %v538_v10  ;;  %vm555_vm6 = vweird.f32 %v538_v10 }
 0x499   :  { %v664_v11 = vpop.eup %663 }
 0x49a   :  { %v540_v12 = vmul.f32 %v664_v11, %v537_v7  ;;  %vm546_vm2 = vweird.f32 %v664_v11 }
 0x49b   :  { %vm547_vm4 = vmor %vm545_vm3, %vm546_vm2 }
 0x49c   :  { %v541_v14 = vmul.f32 %v664_v11, %v540_v12 }
 0x49d   :  { %v666_v13 = vpop.eup %665 }
 0x49e   :  { %v550_v19 = vmul.f32 %v666_v13, %v538_v10  ;;  %v542_v15 = vmul.f32 0.5, %v541_v14  ;;  %vm556_vm5 = vweird.f32 %v666_v13 }
 0x49f   :  { %vm557_vm7 = vmor %vm555_vm6, %vm556_vm5 }
 0x4a0   :  { %v551_v16 = vmul.f32 %v666_v13, %v550_v19  ;;  %v543_v18 = vsub.f32 1.5, %v542_v15 }
 0x4a2   :  { %v552_v20 = vmul.f32 0.5, %v551_v16  ;;  %v544_v21 = vmul.f32 %v664_v11, %v543_v18 }
 0x4a4   :  { %v553_v22 = vsub.f32 1.5, %v552_v20  ;;  %v548_v23 = vsel %vm547_vm4, %v664_v11, %v544_v21 }
 0x4a5   :  { %v560_v35 = vmul.f32 %v634_v17, %v548_v23 }
 0x4a6   :  { %v554_v24 = vmul.f32 %v666_v13, %v553_v22 }
 0x4a7   :  { %v562_v26 = vmul.f32 %v560_v35, %v523_v0 }
 0x4a8   :  { %v558_v25 = vsel %vm557_vm7, %v666_v13, %v554_v24 }
 0x4a9   :  { %v561_v29 = vmul.f32 %v634_v17, %v558_v25  ;;  %564 = vst [vmem:[#allocation11] sm:$0xff] %v562_v26 }
 0x4ab   :  { %v563_v27 = vmul.f32 %v561_v29, %v526_v3 }
 0x4ad   :  { %565 = vst [vmem:[#allocation11 + $0x8] sm:$0xff] %v563_v27 }
 0x4ae   :  { %578 = dma.vmem_to_hbm [thread:$0]  %s571_s16, 256, %s573_s19, [#allocation4], %s821_s1, %s821_s1, %s822_s6  }
 0x4af   :  { %817 = dma.done.wait [#allocation4], 256  }
 0x4b0   :  { %818 = vsyncadd [#allocation4], 4294967040 }
 0x4b1   :  { %583 = vsyncpa [#allocation3], 1 }
 0x4b2   :  { %584 = vsyncpa [#allocation6], 1 }
 0x4b3   :  { %585 = vsyncpa [#allocation9], 1 }
 0x4b4   :  { %586 = vsyncpa [#allocation4], 1 }

</bundles_post_ra>
